<compile_context>
chip_gen: v5e
topology: v5e:2x2
jax: 0.10.0
libtpu: 0.0.40
codegen_flags: <defaults>
</compile_context>

<pallas_src>
import jax
import jax.numpy as jnp
from jax.experimental import pallas as pl
from jax.experimental.pallas import tpu as pltpu


def _attention_kernel(x_ref, w1_ref, b1_ref, w2_ref, b2_ref, o_ref):
    # x_ref/o_ref: (bn, C, ts)   w1_ref: (mid, C)   b1_ref: (mid, 1)
    # w2_ref: (C, mid)           b2_ref: (C, 1)
    w1 = w1_ref[...]
    b1 = b1_ref[...]
    w2 = w2_ref[...]
    b2 = b2_ref[...]
    bn = x_ref.shape[0]
    # bn is a static (trace-time) constant -> plain Python loop; each iteration is two
    # small 2-D matmuls that stay fully hidden under the HBM DMA.
    for b in range(bn):
        x = x_ref[b].astype(jnp.float32)                                      # (C, ts)
        h = jnp.dot(w1, x, preferred_element_type=jnp.float32) + b1           # (mid, ts)
        h = jnp.maximum(h, 0.0)                                               # ReLU
        a = jnp.dot(w2, h, preferred_element_type=jnp.float32) + b2           # (C, ts)
        a = jax.nn.sigmoid(a)                                                 # gate
        o_ref[b] = (x * a).astype(o_ref.dtype)                                # x * attention


def attention_module(x_nchw, w1, b1, w2, b2, *,
                     bytes_per_step_target=2 << 20,   # ~2 MiB of x+out per grid step
                     min_bytes_per_step=512 << 10,    # batch-block below this
                     vmem_budget_bytes=16 << 20):     # (in+out) * double-buffer cap
    """x_nchw: (N, C, H, W); w1: (C//8, C); b1: (C//8,); w2: (C, C//8); b2: (C,)."""
    N, C, H, W = x_nchw.shape
    mid = w1.shape[0]
    HW = H * W
    itemsize = jnp.dtype(x_nchw.dtype).itemsize

    # NCHW kept as-is: channels -> sublanes, flattened spatial -> lanes (free reshape).
    x_rows = x_nchw.reshape(N, C, HW)

    # Lane-dense spatial axis: pad only the trailing spatial dim to the next multiple of
    # 128 (cheap tail pad), sliced off after the kernel.  Zero padding is safe here:
    # the padded columns produce out = 0 * sigmoid(...) = 0 and are discarded.
    HW_pad = ((HW + 127) // 128) * 128
    if HW_pad != HW:
        x_rows = jnp.pad(x_rows, ((0, 0), (0, 0), (0, HW_pad - HW)))

    # ---- spatial tile: multiple of 128 dividing HW_pad, sized from byte budget + VMEM cap
    ts_budget = max(128, bytes_per_step_target // (2 * C * itemsize))
    ts_vmem = max(128, vmem_budget_bytes // (4 * C * itemsize))   # 4 = (in+out)*double-buffer
    ts = max(128, (min(HW_pad, ts_budget, ts_vmem) // 128) * 128)
    while HW_pad % ts != 0:            # terminates at 128 since HW_pad % 128 == 0
        ts -= 128

    # ---- batch blocking: pack images per step until the DMA payload is worth a step
    bn = 1
    for d in range(1, N + 1):
        if N % d != 0:
            continue
        if 4 * d * C * ts * itemsize > vmem_budget_bytes:
            break
        bn = d
        if 2 * d * C * ts * itemsize >= min_bytes_per_step:
            break

    # ---- v7x has 2 TensorCores: guarantee >= 2 parallel grid steps when possible
    n_b, n_s = N // bn, HW_pad // ts
    if n_b * n_s == 1:
        if HW_pad >= 256:
            ts = (HW_pad // 2 // 128) * 128
            while HW_pad % ts != 0:
                ts -= 128
            n_s = HW_pad // ts
        elif N > 1:
            bn = max(d for d in range(1, N // 2 + 1) if N % d == 0)
            n_b = N // bn

    b1c = b1.reshape(mid, 1)
    b2c = b2.reshape(C, 1)

    cost = pl.CostEstimate(
        flops=4 * N * HW_pad * C * mid + 3 * N * HW_pad * C,
        transcendentals=N * HW_pad * C,
        bytes_accessed=(2 * N * C * HW_pad) * itemsize + (2 * C * mid + mid + C) * 4,
    )

    out = pl.pallas_call(
        _attention_kernel,
        out_shape=jax.ShapeDtypeStruct((N, C, HW_pad), x_nchw.dtype),
        grid_spec=pltpu.PrefetchScalarGridSpec(
            num_scalar_prefetch=0,
            grid=(n_b, n_s),
            in_specs=[
                pl.BlockSpec((bn, C, ts), lambda n, s: (n, 0, s)),
                pl.BlockSpec((mid, C), lambda n, s: (0, 0)),   # resident weights
                pl.BlockSpec((mid, 1), lambda n, s: (0, 0)),
                pl.BlockSpec((C, mid), lambda n, s: (0, 0)),
                pl.BlockSpec((C, 1), lambda n, s: (0, 0)),
            ],
            out_specs=pl.BlockSpec((bn, C, ts), lambda n, s: (n, 0, s)),
        ),
        compiler_params=pltpu.CompilerParams(
            dimension_semantics=("parallel", "parallel")),
        cost_estimate=cost,
    )(x_rows, w1, b1c, w2, b2c)

    if HW_pad != HW:
        out = out[:, :, :HW]
    return out.reshape(N, C, H, W)


def _reference(x_nchw, w1, b1, w2, b2):
    # pure-JAX reference of the PyTorch forward (1x1 convs as einsums)
    h = jnp.einsum("nchw,oc->nohw", x_nchw, w1) + b1[None, :, None, None]
    h = jnp.maximum(h, 0.0)
    a = jnp.einsum("nchw,oc->nohw", h, w2) + b2[None, :, None, None]
    a = jax.nn.sigmoid(a)
    return x_nchw * a


if __name__ == "__main__":
    key = jax.random.PRNGKey(0)
    N, C, H, W = 2, 32, 16, 16          # channels must be divisible by 8
    mid = C // 8

    k1, k2, k3, k4, k5 = jax.random.split(key, 5)
    x = jax.random.normal(k1, (N, C, H, W), dtype=jnp.float32)
    # synthetic parameters (conv weight shapes (out, in, 1, 1) squeezed)
    w1 = jax.random.normal(k2, (mid, C), dtype=jnp.float32) * 0.1
    b1 = jax.random.normal(k3, (mid,), dtype=jnp.float32) * 0.1
    w2 = jax.random.normal(k4, (C, mid), dtype=jnp.float32) * 0.1
    b2 = jax.random.normal(k5, (C,), dtype=jnp.float32) * 0.1

    out = attention_module(x, w1, b1, w2, b2)
    out = jax.block_until_ready(out)

    ref = _reference(x, w1, b1, w2, b2)
    assert out.shape == (N, C, H, W)
    assert jnp.allclose(out, ref, atol=1e-5, rtol=1e-5)
    print("KERNEL_OK")
</pallas_src>

<mosaic_0001>
module attributes {stable_mosaic.version = 11 : i64} {
  func.func @_attention_kernel(%arg0: i32, %arg1: i32, %arg2: memref<2x32x128xf32, #tpu.memory_space<vmem>>, %arg3: memref<4x32xf32, #tpu.memory_space<vmem>>, %arg4: memref<4x1xf32, #tpu.memory_space<vmem>>, %arg5: memref<32x4xf32, #tpu.memory_space<vmem>>, %arg6: memref<32x1xf32, #tpu.memory_space<vmem>>, %arg7: memref<2x32x128xf32, #tpu.memory_space<vmem>>) attributes {dimension_semantics = [#tpu.dimension_semantics<parallel>, #tpu.dimension_semantics<parallel>], iteration_bounds = array<i64: 1, 2>, scalar_prefetch = 0 : i64, scratch_operands = 0 : i64, tpu.core_type = #tpu.core_type<tc>, window_params = [{transform_indices = @transform_0, window_bounds = array<i64: 2, 32, 128>}, {pipeline_mode = #tpu.pipeline_mode<synchronous>, transform_indices = @transform_1, window_bounds = array<i64: 4, 32>}, {pipeline_mode = #tpu.pipeline_mode<synchronous>, transform_indices = @transform_2, window_bounds = array<i64: 4, 1>}, {pipeline_mode = #tpu.pipeline_mode<synchronous>, transform_indices = @transform_3, window_bounds = array<i64: 32, 4>}, {pipeline_mode = #tpu.pipeline_mode<synchronous>, transform_indices = @transform_4, window_bounds = array<i64: 32, 1>}, {transform_indices = @transform_5, window_bounds = array<i64: 2, 32, 128>}]} {
    %c0 = arith.constant 0 : index
    %c0_0 = arith.constant 0 : index
    %0 = vector.load %arg3[%c0, %c0_0] : memref<4x32xf32, #tpu.memory_space<vmem>>, vector<4x32xf32>
    %c0_1 = arith.constant 0 : index
    %c0_2 = arith.constant 0 : index
    %1 = vector.load %arg4[%c0_1, %c0_2] : memref<4x1xf32, #tpu.memory_space<vmem>>, vector<4x1xf32>
    %c0_3 = arith.constant 0 : index
    %c0_4 = arith.constant 0 : index
    %2 = vector.load %arg5[%c0_3, %c0_4] : memref<32x4xf32, #tpu.memory_space<vmem>>, vector<32x4xf32>
    %c0_5 = arith.constant 0 : index
    %c0_6 = arith.constant 0 : index
    %3 = vector.load %arg6[%c0_5, %c0_6] : memref<32x1xf32, #tpu.memory_space<vmem>>, vector<32x1xf32>
    %c0_7 = arith.constant 0 : index
    %c0_8 = arith.constant 0 : index
    %c0_9 = arith.constant 0 : index
    %4 = vector.load %arg2[%c0_7, %c0_8, %c0_9] : memref<2x32x128xf32, #tpu.memory_space<vmem>>, vector<1x32x128xf32>
    %5 = vector.shape_cast %4 : vector<1x32x128xf32> to vector<32x128xf32>
    %cst = arith.constant dense<0.000000e+00> : vector<4x128xf32>
    %6 = tpu.matmul %0, %5, %cst {dimension_numbers = #tpu.dot_dimension_numbers<[1], [0], [0], [1], [0, 0, 1, 1], [], []>} : vector<4x32xf32>, vector<32x128xf32>, vector<4x128xf32> -> vector<4x128xf32>
    %7 = vector.broadcast %1 : vector<4x1xf32> to vector<4x128xf32>
    %8 = arith.addf %6, %7 : vector<4x128xf32>
    %cst_10 = arith.constant 0.000000e+00 : f32
    %9 = vector.broadcast %cst_10 : f32 to vector<4x128xf32>
    %10 = arith.maximumf %8, %9 : vector<4x128xf32>
    %cst_11 = arith.constant dense<0.000000e+00> : vector<32x128xf32>
    %11 = tpu.matmul %2, %10, %cst_11 {dimension_numbers = #tpu.dot_dimension_numbers<[1], [0], [0], [1], [0, 0, 1, 1], [], []>} : vector<32x4xf32>, vector<4x128xf32>, vector<32x128xf32> -> vector<32x128xf32>
    %12 = vector.broadcast %3 : vector<32x1xf32> to vector<32x128xf32>
    %13 = arith.addf %11, %12 : vector<32x128xf32>
    %14 = arith.negf %13 : vector<32x128xf32>
    %15 = math.exp %14 : vector<32x128xf32>
    %cst_12 = arith.constant 1.000000e+00 : f32
    %16 = vector.broadcast %cst_12 : f32 to vector<32x128xf32>
    %17 = arith.addf %16, %15 : vector<32x128xf32>
    %18 = arith.divf %16, %17 : vector<32x128xf32>
    %19 = arith.mulf %5, %18 : vector<32x128xf32>
    %c0_13 = arith.constant 0 : index
    %c0_14 = arith.constant 0 : index
    %c0_15 = arith.constant 0 : index
    %20 = vector.load %arg7[%c0_13, %c0_14, %c0_15] : memref<2x32x128xf32, #tpu.memory_space<vmem>>, vector<1x32x128xf32>
    %21 = vector.shape_cast %20 : vector<1x32x128xf32> to vector<32x128xf32>
    %22 = vector.shape_cast %19 : vector<32x128xf32> to vector<1x32x128xf32>
    tpu.vector_store %arg7[%c0_13, %c0_14, %c0_15], %22 {strides = array<i32>} : memref<2x32x128xf32, #tpu.memory_space<vmem>>, vector<1x32x128xf32>,
    %c1 = arith.constant 1 : index
    %c0_16 = arith.constant 0 : index
    %c0_17 = arith.constant 0 : index
    %23 = vector.load %arg2[%c1, %c0_16, %c0_17] : memref<2x32x128xf32, #tpu.memory_space<vmem>>, vector<1x32x128xf32>
    %24 = vector.shape_cast %23 : vector<1x32x128xf32> to vector<32x128xf32>
    %cst_18 = arith.constant dense<0.000000e+00> : vector<4x128xf32>
    %25 = tpu.matmul %0, %24, %cst_18 {dimension_numbers = #tpu.dot_dimension_numbers<[1], [0], [0], [1], [0, 0, 1, 1], [], []>} : vector<4x32xf32>, vector<32x128xf32>, vector<4x128xf32> -> vector<4x128xf32>
    %26 = vector.broadcast %1 : vector<4x1xf32> to vector<4x128xf32>
    %27 = arith.addf %25, %26 : vector<4x128xf32>
    %cst_19 = arith.constant 0.000000e+00 : f32
    %28 = vector.broadcast %cst_19 : f32 to vector<4x128xf32>
    %29 = arith.maximumf %27, %28 : vector<4x128xf32>
    %cst_20 = arith.constant dense<0.000000e+00> : vector<32x128xf32>
    %30 = tpu.matmul %2, %29, %cst_20 {dimension_numbers = #tpu.dot_dimension_numbers<[1], [0], [0], [1], [0, 0, 1, 1], [], []>} : vector<32x4xf32>, vector<4x128xf32>, vector<32x128xf32> -> vector<32x128xf32>
    %31 = vector.broadcast %3 : vector<32x1xf32> to vector<32x128xf32>
    %32 = arith.addf %30, %31 : vector<32x128xf32>
    %33 = arith.negf %32 : vector<32x128xf32>
    %34 = math.exp %33 : vector<32x128xf32>
    %cst_21 = arith.constant 1.000000e+00 : f32
    %35 = vector.broadcast %cst_21 : f32 to vector<32x128xf32>
    %36 = arith.addf %35, %34 : vector<32x128xf32>
    %37 = arith.divf %35, %36 : vector<32x128xf32>
    %38 = arith.mulf %24, %37 : vector<32x128xf32>
    %c1_22 = arith.constant 1 : index
    %c0_23 = arith.constant 0 : index
    %c0_24 = arith.constant 0 : index
    %39 = vector.load %arg7[%c1_22, %c0_23, %c0_24] : memref<2x32x128xf32, #tpu.memory_space<vmem>>, vector<1x32x128xf32>
    %40 = vector.shape_cast %39 : vector<1x32x128xf32> to vector<32x128xf32>
    %41 = vector.shape_cast %38 : vector<32x128xf32> to vector<1x32x128xf32>
    tpu.vector_store %arg7[%c1_22, %c0_23, %c0_24], %41 {strides = array<i32>} : memref<2x32x128xf32, #tpu.memory_space<vmem>>, vector<1x32x128xf32>,
    return
  }
  func.func @transform_0(%arg0: i32, %arg1: i32) -> (i32, i32, i32) {
    %c0_i32 = arith.constant 0 : i32
    %c0_i32_0 = arith.constant 0 : i32
    return %arg0, %c0_i32, %arg1 : i32, i32, i32
  }
  func.func @transform_1(%arg0: i32, %arg1: i32) -> (i32, i32) {
    %c0_i32 = arith.constant 0 : i32
    %c0_i32_0 = arith.constant 0 : i32
    %c0_i32_1 = arith.constant 0 : i32
    return %c0_i32, %c0_i32_0 : i32, i32
  }
  func.func @transform_2(%arg0: i32, %arg1: i32) -> (i32, i32) {
    %c0_i32 = arith.constant 0 : i32
    %c0_i32_0 = arith.constant 0 : i32
    %c0_i32_1 = arith.constant 0 : i32
    return %c0_i32, %c0_i32_0 : i32, i32
  }
  func.func @transform_3(%arg0: i32, %arg1: i32) -> (i32, i32) {
    %c0_i32 = arith.constant 0 : i32
    %c0_i32_0 = arith.constant 0 : i32
    %c0_i32_1 = arith.constant 0 : i32
    return %c0_i32, %c0_i32_0 : i32, i32
  }
  func.func @transform_4(%arg0: i32, %arg1: i32) -> (i32, i32) {
    %c0_i32 = arith.constant 0 : i32
    %c0_i32_0 = arith.constant 0 : i32
    %c0_i32_1 = arith.constant 0 : i32
    return %c0_i32, %c0_i32_0 : i32, i32
  }
  func.func @transform_5(%arg0: i32, %arg1: i32) -> (i32, i32, i32) {
    %c0_i32 = arith.constant 0 : i32
    %c0_i32_0 = arith.constant 0 : i32
    return %arg0, %c0_i32, %arg1 : i32, i32, i32
  }
}

</mosaic_0001>

<bundles_post_ra>
// kernel: tpu_custom_call.1
= control target key start
LH: loop header
LB: loop body
LE: loop exit
PB: predicated region body
PF: predicated region fallthrough
CT: control target
= control target key end

     0   :  { %10 = vsyncpa [#allocation3], 0  ;;  %s1278_s0 = inlined_call_operand.hbm [shape: f32[2,32,256], index: 0, kind: input, shape index: {}]   ;;  %s1279_s1 = inlined_call_operand.vmem [shape: f32[4,32], index: 1, kind: input, shape index: {}]   ;;  %s1280_s2 = inlined_call_operand.vmem [shape: f32[4,1], index: 2, kind: input, shape index: {}]   ;;  %s1281_s3 = inlined_call_operand.vmem [shape: f32[32,4], index: 3, kind: input, shape index: {}]   ;;  %s1282_s4 = inlined_call_operand.vmem [shape: f32[32,1], index: 4, kind: input, shape index: {}]   ;;  %s1283_s5 = inlined_call_operand.hbm [shape: f32[2,32,256], index: 5, kind: output, shape index: {}]  }
   0x1   :  { %12 = vsyncpa [#allocation3 + $0x1], 0 }
   0x2   :  { %13 = vsyncpa [#allocation4], 0 }
   0x3   :  { %15 = vsyncpa [#allocation4 + $0x1], 0  ;;  %s1003_s18 = smov 0   ;;  %s1005_s19 = smov 0  }
   0x4   :  { %s1007_s20 = smov 0   ;;  %s1009_s21 = smov 0  }
   0x5   :  { %s1011_s22 = smov 0   ;;  %s1013_s23 = smov 0  }
   0x6 LB: > { %s705_s24 = sadd.s32 4294967295, %s964_s23   ;;  %s706_s25 = sadd.s32 4294967294, %s964_s23   ;;  %s964_s23 = sphi %s1013_s23, %s21_s23   ;;  %s960_s22 = sphi %s1011_s22, %s1302_s22   ;;  %s956_s21 = sphi %s1009_s21, %s1301_s21   ;;  %s952_s20 = sphi %s1007_s20, %s1300_s20   ;;  %s948_s19 = sphi %s1005_s19, %s1299_s19   ;;  %s944_s18 = sphi %s1003_s18, %s1298_s18  }
   0x7   : > { %s30_s26 = sadd.s32 1, %s960_s22  ;;  %s42_s27 = sadd.s32 1, %s952_s20 }
   0x8   : > { %p31_p0 = scmp.ge.s32.totalorder %s30_s26, 2  ;;  %p49_p1 = scmp.ne.s32.totalorder %s952_s20, %s948_s19 }
   0x9   : > { %p50_p2 = scmp.eq.s32.totalorder %s964_s23, 0  ;;  %p55_p3 = scmp.ne.s32.totalorder %s948_s19, %s944_s18 }
   0xa   : > { %s1304_s26 = smov (%p31_p0, %s30_s26), 0  ;;  %p56_p5 = scmp.eq.s32.totalorder %s705_s24, 0 }
   0xb   : > { %p1044_p4 = por %p50_p2, %p49_p1  ;;  %s38_s29 = ssub.s32 %s960_s22, %s1304_s26 }
   0xc   : > { %p165_p6 = scmp.eq.s32.totalorder %s705_s24, 1  ;;  %p40_p7 = scmp.eq.s32.totalorder %s38_s29, 0 }
   0xd   : > { %p1050_p8 = por %p56_p5, %p55_p3  ;;  %p171_p10 = scmp.eq.s32.totalorder %s706_s25, 1 }
   0xe   : > { %p1054_p9 = por %p165_p6, %p49_p1  ;;  %p708_p12 = scmp.ge.s32.totalorder %s964_s23, 2 }
   0xf   : > { %s1059_s7 = scalar_select %p40_p7, %s952_s20, %s42_s27  }
  0x10   : > { %p1061_p11 = por %p171_p10, %p55_p3  ;;  %p760_p13 = scmp.lt.s32.totalorder %s964_s23, 2 }
  0x11   : > { %s203_s9 = sand.u32 1, %s952_s20   ;;  %s710_s11 = sshll.u32 %s960_s22, 3 }
  0x12   : > { %s709_s10 = sshll.u32 %s203_s9, 6  ;;  %s214_s14 = scalar_lea.hbm %s1278_s0, %s710_s11 }
  0x13   : > { %s207_s15 = scalar_lea.vmem [#allocation2], %s709_s10  ;;  %s215_s17 = sshll.u32 %s214_s14, 4  ;;  %s216_s17 = int_to_ptr.hbm [resolvable:$true] %s215_s17 }
  0x14   : > { %s217_s16 = sshll.u32 %s207_s15, 4  ;;  %p753_p0 = pnand %p760_p13, %p1044_p4  ;;  %s218_s16 = int_to_ptr.vmem [resolvable:$true] %s217_s16 }
  0x15   : > { %s204_s24 = scalar_lea.sflag [#allocation3], %s203_s9  ;;  %s966_s25 = smov 256  }
  0x16   : > { %s967_s27 = smov 128   ;;  %s968_s29 = smov 8  }
  0x17   : > { %755 = dma.hbm_to_vmem [thread:$0]  (!%p753_p0), %s216_s17, 1024, %s218_s16, %s204_s24, %s966_s25, %s967_s27, %s968_s29  }
  0x18   : > { %p711_p1 = scmp.ge.s32.totalorder %s964_s23, 1  ;;  %p225_p2 = scmp.lt.s32.totalorder %s964_s23, 3 }
  0x1a   : > { %p226_p3 = pnand %p711_p1, %p225_p2 }
  0x1b   : > { %s1077_s12 = sand.u32 (!%p226_p3), 1, %s948_s19  }
  0x1c   : > { %229 = sbr.rel (%p226_p3) target bundleno = 370 (0x172), region = 40  ;;  %s712_s10 = sshll.u32 (!%p226_p3), %s1077_s12, 6 }
  0x1d   : > { %s232_s11 = scalar_lea.sflag (!%p226_p3), [#allocation3], %s1077_s12  ;;  %s235_s28 = scalar_lea.vmem (!%p226_p3), [#allocation2], %s712_s10 }
  0x21   : > { %935 = dma.done.wait (%p1050_p8), %s232_s11, 1024  }
  0x22   : > { %937 = vsyncadd (%p1050_p8), %s232_s11, 4294966272  ;;  %v969_v0 = vmov 0   ;;  %v1087_v1 = vld [vmem:[%s235_s28 + $0x18] sm:$0xff]  ;;  %v1091_v3 = vld [vmem:[%s235_s28 + $0x10] sm:$0xff]  ;;  %vm284_vm0 = vcmask 261120   ;;  %vm342_vm1 = vcmask 1043456  }
  0x23   : > { %817 = vset.pattern.permute.xlu0 %v969_v0  ;;  %818 = vset.pattern.permute.xlu1 %v969_v0  ;;  %v1089_v2 = vld [vmem:[%s235_s28 + $0x38] sm:$0xff]  ;;  %v1095_v4 = vld [vmem:[%s235_s28 + $0x30] sm:$0xff]  ;;  %v1097_v5 = vld [vmem:[%s235_s28 + $0x8] sm:$0xff]  ;;  %vm329_vm2 = vcmask 31744   ;;  %s1170_s24 = scalar_lea.vmem [#allocation5], %s712_s10  ;;  %s743_s10 = sshll.u32 %s956_s21, 3 }
  0x24   : > { %819 = vset.pattern.permute.xlu2 %v969_v0  ;;  %300 = vmatpush.msra.mxu0 %v1087_v1  ;;  %v1099_v6 = vld [vmem:[%s235_s28 + $0x28] sm:$0xff]  ;;  %v266_v7 = vld [vmem:[%s1280_s2] sm:$0xf]  ;;  %v273_v13 = vld [vmem:[%s1282_s4 + $0x10] sm:$0xff]  ;;  %s616_s29 = scalar_lea.hbm %s1283_s5, %s743_s10  ;;  %s617_s11 = sshll.u32 %s1170_s24, 4  ;;  %s618_s11 = int_to_ptr.vmem [resolvable:$true] %s617_s11 }
  0x25   : > { %476 = vmatpush.msra.mxu2 %v1089_v2  ;;  %v1106_v8 = vld [vmem:[%s235_s28] sm:$0xff]  ;;  %281 = vperm.xlu0 %817, %v266_v7   ;;  %v272_v12 = vld [vmem:[%s1282_s4 + $0x8] sm:$0xff]  ;;  %v274_v14 = vld [vmem:[%s1282_s4 + $0x18] sm:$0xff]  ;;  %s603_s21 = scalar_lea.sflag [#allocation4], %s1077_s12  ;;  %s902_s15 = scalar_lea.hbm %s1283_s5, 128 }
  0x26   : > { %301 = vmatpush.msra.mxu0 %v1091_v3  ;;  %v1108_v9 = vld [vmem:[%s235_s28 + $0x20] sm:$0xff]  ;;  %316 = vperm.xlu1 %818, %v272_v12   ;;  %v268_v20 = vld [vmem:[%s1281_s3 + $0x8] sm:$0xff]  ;;  %v269_v24 = vld [vmem:[%s1281_s3 + $0x10] sm:$0xff]  ;;  %s619_s28 = sshll.u32 %s616_s29, 4  ;;  %s620_s28 = int_to_ptr.hbm [resolvable:$true] %s619_s28 }
  0x27   : > { %477 = vmatpush.msra.mxu2 %v1095_v4  ;;  %v265_v10 = vld [vmem:[%s1279_s1] sm:$0xf]  ;;  %326 = vperm.xlu2 %819, %v274_v14   ;;  %v270_v25 = vld [vmem:[%s1281_s3 + $0x18] sm:$0xff]  ;;  %s896_s30 = sshra.s32 %s620_s28, 4  ;;  %s897_s30 = int_to_ptr.hbm [resolvable:$true] %s896_s30 }
  0x28   : > { %302 = vmatpush.msra.mxu0 %v1097_v5  ;;  %v271_v11 = vld [vmem:[%s1282_s4] sm:$0xff]  ;;  %s898_s9 = scalar_lea.hbm %s897_s30, 64  ;;  %p903_p7 = scmp.lt.s32.totalorder %s897_s30, %s1283_s5 }
  0x29   : > { %478 = vmatpush.msra.mxu2 %v1099_v6  ;;  %v267_v19 = vld [vmem:[%s1281_s3] sm:$0xff]  ;;  %p899_p4 = scmp.ne.s32.totalorder %s897_s30, %s898_s9  ;;  %p904_p8 = scmp.lt.s32.totalorder %s902_s15, %s898_s9 }
  0x2a   : > { %303 = vmatpush.msra.mxu0 %v1106_v8 }
  0x2b   : > { %479 = vmatpush.msra.mxu2 %v1108_v9  ;;  %714 = vmatmul.msk.f32.vlgmr.msra.gmra.mxu0 %vm284_vm0, %v265_v10  ;;  %p900_p5 = pnand %p899_p4, %p1054_p9  ;;  %p905_p10 = por %p904_p8, %p903_p7 }
  0x2c   : > { %728 = vmatmul.msk.f32.vlgmr.msra.gmra.mxu2 %vm284_vm0, %v265_v10 }
  0x2d   : > { %311 = vperm.xlu0 %817, %v271_v11   ;;  %p901_p6 = pneg %p900_p5 }
  0x2e   : > { %321 = vperm.xlu1 %818, %v273_v13  }
  0x2f   : > { %p906_p13 = pnand %p905_p10, %p901_p6 }
  0x81   : > { %v1149_v46 = vpop.permute.xlu2 %326 }
  0x97   : > { %v282_v15 = vpop.permute.xlu0 %281 }
  0x98   : > { %v317_v26 = vpop.permute.xlu1 %316 }
  0x9f   : > { %v312_v27 = vpop.permute.xlu0 %311 }
  0xa0   : > { %v322_v34 = vpop.permute.xlu1 %321 }
  0xa8   : > { %v305_v16 = vpop.f32.mrf.mxu0 }
  0xa9   : > { %v306_v17 = vadd.f32 %v305_v16, %v282_v15 }
  0xab   : > { %v308_v18 = vmax.f32 %v306_v17, 0.0 }
  0xad   : > { %715 = vmatpush.msk.msrb.mxu0 %vm342_vm1, %v308_v18  ;;  %746 = vmatpush.msk.msra.mxu1 %vm342_vm1, %v308_v18 }
  0xae   : > { %716 = vmatmul.msk.f32.vlgmr.msrb.gmra.mxu0 %vm329_vm2, %v267_v19  ;;  %717 = vmatmul.msk.f32.vlgmr.msra.gmra.mxu1 %vm329_vm2, %v268_v20 }
  0xaf   : > { %v481_v21 = vpop.f32.mrf.mxu2 }
  0xb0   : > { %v482_v22 = vadd.f32 %v481_v21, %v282_v15 }
  0xb2   : > { %v484_v23 = vmax.f32 %v482_v22, 0.0 }
  0xb4   : > { %729 = vmatpush.msk.msrb.mxu2 %vm342_vm1, %v484_v23  ;;  %747 = vmatpush.msk.msra.mxu3 %vm342_vm1, %v484_v23 }
  0xb5   : > { %730 = vmatmul.msk.f32.vlgmr.msrb.gmra.mxu2 %vm329_vm2, %v267_v19  ;;  %731 = vmatmul.msk.f32.vlgmr.msra.gmra.mxu3 %vm329_vm2, %v268_v20 }
  0xb6   : > { %718 = vmatmul.msk.f32.gmra.mxu1 %vm329_vm2, %v269_v24 }
  0xbd   : > { %732 = vmatmul.msk.f32.gmra.mxu3 %vm329_vm2, %v269_v24 }
  0xbe   : > { %719 = vmatmul.msk.f32.gmra.mxu1 %vm329_vm2, %v270_v25 }
  0xc5   : > { %733 = vmatmul.msk.f32.gmra.mxu3 %vm329_vm2, %v270_v25 }
 0x12b   : > { %v363_v28 = vpop.f32.mrf.mxu0  ;;  %v366_v29 = vpop.f32.mrf.mxu1 }
 0x12c   : > { %v364_v30 = vadd.f32 %v363_v28, %v312_v27  ;;  %v367_v31 = vadd.f32 %v366_v29, %v317_v26 }
 0x12e   : > { %v720_v32 = vmul.f32 -1.442695, %v364_v30  ;;  %v721_v33 = vmul.f32 -1.442695, %v367_v31 }
 0x130   : > { %820 = vpow2.f32 %v720_v32 }
 0x131   : > { %822 = vpow2.f32 %v721_v33 }
 0x133   : > { %v369_v35 = vpop.f32.mrf.mxu1 }
 0x134   : > { %v370_v36 = vadd.f32 %v369_v35, %v322_v34 }
 0x136   : > { %v821_v37 = vpop.eup %820  ;;  %v722_v38 = vmul.f32 -1.442695, %v370_v36 }
 0x137   : > { %v823_v39 = vpop.eup %822  ;;  %v387_v40 = vadd.f32 1.0, %v821_v37 }
 0x138   : > { %v505_v41 = vpop.f32.mrf.mxu2  ;;  %v508_v42 = vpop.f32.mrf.mxu3  ;;  %v388_v43 = vadd.f32 1.0, %v823_v39  ;;  %824 = vpow2.f32 %v722_v38 }
 0x139   : > { %v506_v44 = vadd.f32 %v505_v41, %v312_v27  ;;  %v509_v45 = vadd.f32 %v508_v42, %v317_v26  ;;  %826 = vrcp.f32 %v387_v40  ;;  %v402_v59 = vand.u32 2147483648, %v387_v40 }
 0x13a   : > { %828 = vrcp.f32 %v388_v43  ;;  %v417_v62 = vand.u32 2147483648, %v388_v43  ;;  %vm411_vm3 = vweird.f32 %v388_v43  ;;  %v415_v10 = vand.u32 2147483647, %v388_v43 }
 0x13b   : > { %v734_v47 = vmul.f32 -1.442695, %v506_v44  ;;  %v735_v48 = vmul.f32 -1.442695, %v509_v45  ;;  %v372_v49 = vpop.f32.mrf.mxu1  ;;  %v400_v13 = vand.u32 2147483647, %v387_v40  ;;  %vm396_vm6 = vweird.f32 %v387_v40 }
 0x13c   : > { %v373_v50 = vadd.f32 %v372_v49, %v1149_v46  ;;  %v418_v19 = vor.u32 1.1754944e-38, %v417_v62  ;;  %v403_v21 = vor.u32 1.1754944e-38, %v402_v59  ;;  %vm416_vm9 = vcmp.eq.f32.partialorder %v415_v10, 8.507059e+37 }
 0x13d   : > { %830 = vpow2.f32 %v734_v47  ;;  %vm401_vm10 = vcmp.eq.f32.partialorder %v400_v13, 8.507059e+37 }
 0x13e   : > { %v825_v51 = vpop.eup %824  ;;  %832 = vpow2.f32 %v735_v48  ;;  %v723_v52 = vmul.f32 -1.442695, %v373_v50 }
 0x13f   : > { %v827_v53 = vpop.eup %826  ;;  %v389_v54 = vadd.f32 1.0, %v825_v51 }
 0x140   : > { %v511_v55 = vpop.f32.mrf.mxu3  ;;  %v829_v56 = vpop.eup %828  ;;  %v392_v57 = vmul.f32 %v827_v53, %v387_v40  ;;  %vm397_vm5 = vweird.f32 %v827_v53 }
 0x141   : > { %v512_v58 = vadd.f32 %v511_v55, %v322_v34  ;;  %v407_v60 = vmul.f32 %v829_v56, %v388_v43  ;;  %834 = vrcp.f32 %v389_v54  ;;  %vm412_vm4 = vweird.f32 %v829_v56  ;;  %vm398_vm8 = vmor %vm396_vm6, %vm397_vm5 }
 0x142   : > { %v393_v61 = vsub.f32 1.0, %v392_v57  ;;  %836 = vpow2.f32 %v723_v52  ;;  %vm1156_vm7 = vmor %vm411_vm3, %vm412_vm4  ;;  %v430_v26 = vand.u32 2147483647, %v389_v54  ;;  %vm426_vm11 = vweird.f32 %v389_v54 }
 0x143   : > { %v736_v63 = vmul.f32 -1.442695, %v512_v58  ;;  %v831_v0 = vpop.eup %830  ;;  %v408_v7 = vsub.f32 1.0, %v407_v60  ;;  %v432_v29 = vand.u32 2147483648, %v389_v54 }
 0x144   : > { %v833_v11 = vpop.eup %832  ;;  %v394_v12 = vmul.f32 %v827_v53, %v393_v61  ;;  %v1152_v14 = vadd.f32 1.0, %v831_v0  ;;  %vm1173_vm13 = vcmp.eq.f32.partialorder %v430_v26, 8.507059e+37 }
 0x145   : > { %v409_v15 = vmul.f32 %v829_v56, %v408_v7  ;;  %v1154_v16 = vadd.f32 1.0, %v833_v11  ;;  %838 = vpow2.f32 %v736_v63  ;;  %v433_v41 = vor.u32 1.1754944e-38, %v432_v29 }
 0x146   : > { %v395_v17 = vadd.f32 %v827_v53, %v394_v12  ;;  %840 = vrcp.f32 %v1152_v14  ;;  %v542_v43 = vand.u32 2147483647, %v1152_v14  ;;  %v544_v45 = vand.u32 2147483648, %v1152_v14 }
 0x147   : > { %v835_v20 = vpop.eup %834  ;;  %v410_v22 = vadd.f32 %v829_v56, %v409_v15  ;;  %842 = vrcp.f32 %v1154_v16  ;;  %v557_v50 = vand.u32 2147483647, %v1154_v16  ;;  %v559_v51 = vand.u32 2147483648, %v1154_v16 }
 0x148   : > { %v837_v23 = vpop.eup %836  ;;  %v399_v24 = vsel %vm398_vm8, %v827_v53, %v395_v17  ;;  %v422_v25 = vmul.f32 %v835_v20, %v389_v54  ;;  %vm427_vm12 = vweird.f32 %v835_v20  ;;  %v514_v36 = vpop.f32.mrf.mxu3  ;;  %vm538_vm15 = vweird.f32 %v1152_v14 }
 0x149   : > { %v404_v27 = vsel %vm401_vm10, %v403_v21, %v399_v24  ;;  %v414_v28 = vsel %vm1156_vm7, %v829_v56, %v410_v22  ;;  %v1166_v35 = vadd.f32 1.0, %v837_v23  ;;  %vm1181_vm14 = vmor %vm426_vm11, %vm427_vm12  ;;  %v515_v48 = vadd.f32 %v514_v36, %v1149_v46 }
 0x14a   : > { %v451_v30 = vmul.f32 %v404_v27, %v1106_v8  ;;  %v419_v31 = vsel %vm416_vm9, %v418_v19, %v414_v28  ;;  %v423_v32 = vsub.f32 1.0, %v422_v25  ;;  %vm553_vm0 = vweird.f32 %v1154_v16 }
 0x14b   : > { %v839_v33 = vpop.eup %838  ;;  %v452_v34 = vmul.f32 %v419_v31, %v1097_v5  ;;  %844 = vrcp.f32 %v1166_v35  ;;  %vm1200_vm2 = vcmp.eq.f32.partialorder %v542_v43, 8.507059e+37  ;;  %v737_v58 = vmul.f32 -1.442695, %v515_v48 }
 0x14c   : > { %v841_v37 = vpop.eup %840  ;;  %455 = vst [vmem:[%s1170_s24] sm:$0xff] %v451_v30  ;;  %v424_v38 = vmul.f32 %v835_v20, %v423_v32  ;;  %v1177_v8 = vadd.f32 1.0, %v839_v33  ;;  %v545_v61 = vor.u32 1.1754944e-38, %v544_v45  ;;  %vm1205_vm4 = vcmp.eq.f32.partialorder %v557_v50, 8.507059e+37 }
 0x14d   : > { %v843_v40 = vpop.eup %842  ;;  %456 = vst [vmem:[%s1170_s24 + $0x8] sm:$0xff] %v452_v34  ;;  %v534_v42 = vmul.f32 %v841_v37, %v1152_v14  ;;  %vm539_vm1 = vweird.f32 %v841_v37  ;;  %v560_v63 = vor.u32 1.1754944e-38, %v559_v51  ;;  %vm441_vm6 = vweird.f32 %v1166_v35 }
 0x14e   : > { %v425_v44 = vadd.f32 %v835_v20, %v424_v38  ;;  %v549_v47 = vmul.f32 %v843_v40, %v1154_v16  ;;  %846 = vrcp.f32 %v1177_v8  ;;  %vm554_vm3 = vweird.f32 %v843_v40  ;;  %vm540_vm5 = vmor %vm538_vm15, %vm539_vm1 }
 0x14f   : > { %v535_v49 = vsub.f32 1.0, %v534_v42  ;;  %848 = vpow2.f32 %v737_v58  ;;  %vm555_vm7 = vmor %vm553_vm0, %vm554_vm3  ;;  %v445_v11 = vand.u32 2147483647, %v1166_v35  ;;  %v447_v12 = vand.u32 2147483648, %v1166_v35 }
 0x150   : > { %v429_v52 = vsel %vm1181_vm14, %v835_v20, %v425_v44  ;;  %v550_v53 = vsub.f32 1.0, %v549_v47  ;;  %v574_v23 = vand.u32 2147483648, %v1177_v8  ;;  %v572_v26 = vand.u32 2147483647, %v1177_v8 }
 0x151   : > { %v434_v54 = vsel %vm1173_vm13, %v433_v41, %v429_v52  ;;  %v536_v46 = vmul.f32 %v841_v37, %v535_v49  ;;  %v845_v59 = vpop.eup %844  ;;  %vm446_vm10 = vcmp.eq.f32.partialorder %v445_v11, 8.507059e+37  ;;  %v448_v22 = vor.u32 1.1754944e-38, %v447_v12 }
 0x152   : > { %v453_v56 = vmul.f32 %v434_v54, %v1091_v3  ;;  %v551_v57 = vmul.f32 %v843_v40, %v550_v53  ;;  %v437_v7 = vmul.f32 %v845_v59, %v1166_v35  ;;  %vm442_vm8 = vweird.f32 %v845_v59 }
 0x153   : > { %v537_v60 = vadd.f32 %v841_v37, %v536_v46  ;;  %vm443_vm9 = vmor %vm441_vm6, %vm442_vm8  ;;  %vm568_vm12 = vweird.f32 %v1177_v8  ;;  %v575_v30 = vor.u32 1.1754944e-38, %v574_v23  ;;  %vm573_vm14 = vcmp.eq.f32.partialorder %v572_v26, 8.507059e+37 }
 0x154   : > { %457 = vst [vmem:[%s1170_s24 + $0x10] sm:$0xff] %v453_v56  ;;  %v552_v0 = vadd.f32 %v843_v40, %v551_v57  ;;  %v847_v3 = vpop.eup %846  ;;  %v438_v15 = vsub.f32 1.0, %v437_v7 }
 0x155   : > { %v541_v10 = vsel %vm540_vm5, %v841_v37, %v537_v60  ;;  %v564_v17 = vmul.f32 %v847_v3, %v1177_v8  ;;  %v849_v24 = vpop.eup %848  ;;  %vm569_vm11 = vweird.f32 %v847_v3 }
 0x156   : > { %v546_v13 = vsel %vm1200_vm2, %v545_v61, %v541_v10  ;;  %v556_v14 = vsel %vm555_vm7, %v843_v40, %v552_v0  ;;  %v439_v20 = vmul.f32 %v845_v59, %v438_v15  ;;  %vm570_vm13 = vmor %vm568_vm12, %vm569_vm11 }
 0x157   : > { %v593_v18 = vmul.f32 %v1108_v9, %v546_v13  ;;  %v561_v19 = vsel %vm1205_vm4, %v560_v63, %v556_v14  ;;  %v565_v21 = vsub.f32 1.0, %v564_v17 }
 0x158   : > { %v594_v16 = vmul.f32 %v1099_v6, %v561_v19  ;;  %v440_v25 = vadd.f32 %v845_v59, %v439_v20  ;;  %v532_v6 = vadd.f32 1.0, %v849_v24 }
 0x159   : > { %738 = vst [vmem:[%s1170_s24 + $0x20] sm:$0xff] %v593_v18  ;;  %v566_v9 = vmul.f32 %v847_v3, %v565_v21 }
 0x15a   : > { %739 = vst [vmem:[%s1170_s24 + $0x28] sm:$0xff] %v594_v16  ;;  %v444_v27 = vsel %vm443_vm9, %v845_v59, %v440_v25  ;;  %850 = vrcp.f32 %v532_v6  ;;  %v589_v38 = vand.u32 2147483648, %v532_v6  ;;  %vm583_vm0 = vweird.f32 %v532_v6 }
 0x15b   : > { %v567_v28 = vadd.f32 %v847_v3, %v566_v9  ;;  %v449_v29 = vsel %vm446_vm10, %v448_v22, %v444_v27 }
 0x15c   : > { %v454_v31 = vmul.f32 %v449_v29, %v1087_v1  ;;  %v587_v1 = vand.u32 2147483647, %v532_v6 }
 0x15d   : > { %v571_v32 = vsel %vm570_vm13, %v847_v3, %v567_v28 }
 0x15e   : > { %v576_v33 = vsel %vm573_vm14, %v575_v30, %v571_v32  ;;  %458 = vst [vmem:[%s1170_s24 + $0x18] sm:$0xff] %v454_v31  ;;  %vm588_vm2 = vcmp.eq.f32.partialorder %v587_v1, 8.507059e+37 }
 0x15f   : > { %v595_v34 = vmul.f32 %v1095_v4, %v576_v33  ;;  %v590_v4 = vor.u32 1.1754944e-38, %v589_v38 }
 0x160   : > { %v851_v35 = vpop.eup %850 }
 0x161   : > { %740 = vst [vmem:[%s1170_s24 + $0x30] sm:$0xff] %v595_v34  ;;  %v579_v36 = vmul.f32 %v851_v35, %v532_v6  ;;  %vm584_vm15 = vweird.f32 %v851_v35 }
 0x162   : > { %vm585_vm1 = vmor %vm583_vm0, %vm584_vm15 }
 0x163   : > { %v580_v37 = vsub.f32 1.0, %v579_v36 }
 0x165   : > { %v581_v39 = vmul.f32 %v851_v35, %v580_v37 }
 0x167   : > { %v582_v8 = vadd.f32 %v851_v35, %v581_v39 }
 0x169   : > { %v586_v40 = vsel %vm585_vm1, %v851_v35, %v582_v8 }
 0x16a   : > { %v591_v5 = vsel %vm588_vm2, %v590_v4, %v586_v40 }
 0x16b   : > { %v596_v41 = vmul.f32 %v1089_v2, %v591_v5 }
 0x16d   : > { %741 = vst [vmem:[%s1170_s24 + $0x38] sm:$0xff] %v596_v41 }
 0x16e   : > { %909 = shalt.err (!%p906_p13)
}
 0x16f   : > { %s970_s12 = smov 128   ;;  %s971_s24 = smov 256  }
 0x170   : > { %s972_s10 = smov 8  }
 0x171   : > { %750 = dma.vmem_to_hbm [thread:$0]  (%p1054_p9), %s618_s11, 1024, %s620_s28, %s603_s21, %s970_s12, %s971_s24, %s972_s10  }
 0x172 PF: > { %s634_s25 = sand.u32 1, %s944_s18   ;;  %p757_p0 = pnand %p708_p12, %p1061_p11 }
 0x173   : > { %s635_s27 = scalar_lea.sflag [#allocation4], %s634_s25 }
 0x174   : > { %p758_p1 = pneg %p757_p0 }
 0x176   : > { %939 = dma.done.wait (%p758_p1), %s635_s27, 1024  }
 0x177   : > { %941 = vsyncadd (%p758_p1), %s635_s27, 4294966272  ;;  %s21_s23 = sadd.s32 1, %s964_s23   ;;  %s1298_s18 = smov %s948_s19 }
 0x178   : > { %p18_p2 = scmp.ge.s32.totalorder %s21_s23, 4   ;;  %s1299_s19 = smov %s952_s20 }
 0x179   : > { %s1300_s20 = smov %s1059_s7  ;;  %s1301_s21 = smov %s960_s22 }
 0x17a   : > { %s1302_s22 = smov %s1304_s26  ;;  %20 = sbr.rel (!%p18_p2) target bundleno = 6 (0x6), region = 87 }
 0x17f   :  { %641 = vsyncpa [#allocation3], 1 }
 0x180   :  { %643 = vsyncpa [#allocation3 + $0x1], 1 }
 0x181   :  { %644 = vsyncpa [#allocation4], 1 }
 0x182   :  { %646 = vsyncpa [#allocation4 + $0x1], 1 }

</bundles_post_ra>
